<compile_context>
chip_gen: v5e
topology: v5e:2x2
jax: 0.10.0
libtpu: 0.0.40
codegen_flags: <defaults>
</compile_context>

<pallas_src>
import functools

import jax
import jax.numpy as jnp
from jax import lax
from jax.experimental import pallas as pl
from jax.experimental.pallas import tpu as pltpu


def _gelu_tanh(v):
    # tanh-approximate GELU (EUP tanh instead of VALU erf polynomial).
    c = 0.7978845608028654  # sqrt(2/pi)
    return 0.5 * v * (1.0 + jnp.tanh(c * (v + 0.044715 * v * v * v)))


def _gelu_exact(v):
    # torch.nn.GELU() default: 0.5 * v * (1 + erf(v / sqrt(2))) -- reference only.
    return 0.5 * v * (1.0 + lax.erf(v * 0.7071067811865476))


def inverted_bottleneck_kernel(x_ref, w1_ref, w3_ref, mask_ref, small_ref,
                               o_ref, *, W, ch):
    """One batch element per grid step.

    Layouts (per step):
      x_ref    : (1, ch,  HW)   rows = channel, lanes = h*W + w
      w1_ref   : (mid, ch)      BN1-folded expand weight (resident)
      w3_ref   : (ch, mid)      BN3-folded project weight (resident)
      mask_ref : (9, 1, HW)     precomputed zero-padding masks per 3x3 tap
      small_ref: (12, mid, 1)   [0]=b1, [1]=b2, [2]=b3 (zero-padded to mid),
                                [3+tap]=folded depthwise tap weights
    """
    HW = x_ref.shape[-1]

    # --- 1x1 expand conv (BN1 folded) : one MXU matmul + tanh-GELU ----------
    h = jnp.dot(w1_ref[...], x_ref[0], preferred_element_type=jnp.float32)
    h = _gelu_tanh(h + small_ref[0])                         # (mid, HW)

    # --- depthwise 3x3 conv, padding=1 (BN2 folded) --------------------------
    # XLU lane-rolls select the tap; the precomputed mask fuses zero-padding
    # (and kills wrap-around lanes) with a single multiply per tap.
    acc = jnp.zeros_like(h)
    for dy in (-1, 0, 1):
        for dx in (-1, 0, 1):
            tap = (dy + 1) * 3 + (dx + 1)
            d = dy * W + dx                                  # lane offset of tap
            src = h if d == 0 else pltpu.roll(h, shift=(-d) % HW, axis=1)
            masked = src if tap == 4 else src * mask_ref[tap]
            acc = acc + small_ref[3 + tap] * masked
    h2 = _gelu_tanh(acc + small_ref[1])                      # (mid, HW)

    # --- 1x1 project conv (BN3 folded) + residual ----------------------------
    y = jnp.dot(w3_ref[...], h2, preferred_element_type=jnp.float32)
    b3 = small_ref[2][:ch]                                   # (ch, 1)
    o_ref[0] = (x_ref[0] + y + b3).astype(o_ref.dtype)       # reload x: vld idle


def inverted_bottleneck(x, params, *, eps=1e-5):
    """x: (N, ch, H, W) f32 NCHW.  params: conv weights + BatchNorm params."""
    N, ch, H, W = x.shape
    HW = H * W
    w1 = params["w1"][:, :, 0, 0]                            # (mid, ch)
    wd = params["wd"][:, 0].reshape(-1, 9)                   # (mid, 9), tap=ky*3+kx
    w3 = params["w3"][:, :, 0, 0]                            # (ch, mid)
    mid = w1.shape[0]

    # Fold inference-mode BatchNorm into conv weights + per-channel biases.
    # TODO(synk): training-mode batch statistics are not computed in-kernel.
    def fold(p):
        g, b, m, v = p
        s = g / jnp.sqrt(v + eps)
        return s, b - m * s

    s1, b1 = fold(params["bn1"])
    s2, b2 = fold(params["bn2"])
    s3, b3 = fold(params["bn3"])

    w1f = (w1 * s1[:, None]).astype(x.dtype)                 # (mid, ch)
    wdf = (wd * s2[:, None]).astype(x.dtype)                 # (mid, 9)
    w3f = (w3 * s3[:, None]).astype(x.dtype)                 # (ch, mid)

    # Precompute the 9 zero-padding masks over the flattened plane (lane dim).
    hh = jnp.arange(H)[:, None]
    ww = jnp.arange(W)[None, :]
    mask_list = []
    for dy in (-1, 0, 1):
        for dx in (-1, 0, 1):
            valid = ((hh + dy >= 0) & (hh + dy < H) &
                     (ww + dx >= 0) & (ww + dx < W))
            mask_list.append(valid.reshape(1, HW))
    masks = jnp.stack(mask_list, axis=0).astype(x.dtype)     # (9, 1, HW)

    # Pack the tiny per-channel operands into a single block:
    #   row 0: b1, row 1: b2, row 2: b3 zero-padded to mid, rows 3..11: taps.
    b3p = jnp.zeros((mid,), x.dtype).at[:ch].set(b3.astype(x.dtype))
    small = jnp.concatenate(
        [b1.astype(x.dtype)[None], b2.astype(x.dtype)[None], b3p[None], wdf.T],
        axis=0)[:, :, None]                                  # (12, mid, 1)

    x3 = x.reshape(N, ch, HW)                                # contiguous: free

    kern = functools.partial(inverted_bottleneck_kernel, W=W, ch=ch)

    out = pl.pallas_call(
        kern,
        out_shape=jax.ShapeDtypeStruct((N, ch, HW), x.dtype),
        grid_spec=pltpu.PrefetchScalarGridSpec(
            num_scalar_prefetch=0,
            grid=(N,),                                       # batch axis: independent
            in_specs=[
                pl.BlockSpec((1, ch, HW), lambda n: (n, 0, 0)),
                pl.BlockSpec((mid, ch), lambda n: (0, 0)),       # resident
                pl.BlockSpec((ch, mid), lambda n: (0, 0)),       # resident
                pl.BlockSpec((9, 1, HW), lambda n: (0, 0, 0)),   # resident
                pl.BlockSpec((12, mid, 1), lambda n: (0, 0, 0)), # resident
            ],
            out_specs=pl.BlockSpec((1, ch, HW), lambda n: (n, 0, 0)),
        ),
        compiler_params=pltpu.CompilerParams(
            dimension_semantics=("parallel",)),              # v7x: 2 TCs usable
    )(x3, w1f, w3f, masks, small)

    return out.reshape(N, ch, H, W)


def inverted_bottleneck_ref(x, params, *, eps=1e-5):
    """Pure-JAX reference of the PyTorch module (BatchNorm in eval mode)."""
    def bn(y, p):
        g, b, m, v = p
        return ((y - m[None, :, None, None])
                / jnp.sqrt(v + eps)[None, :, None, None]
                * g[None, :, None, None] + b[None, :, None, None])

    w1, wd, w3 = params["w1"], params["wd"], params["w3"]
    mid = w1.shape[0]
    dn = ("NCHW", "OIHW", "NCHW")
    hp = lax.Precision.HIGHEST

    y = lax.conv_general_dilated(x, w1, (1, 1), [(0, 0), (0, 0)],
                                 dimension_numbers=dn, precision=hp)
    y = _gelu_exact(bn(y, params["bn1"]))
    y = lax.conv_general_dilated(y, wd, (1, 1), [(1, 1), (1, 1)],
                                 dimension_numbers=dn,
                                 feature_group_count=mid, precision=hp)
    y = _gelu_exact(bn(y, params["bn2"]))
    y = lax.conv_general_dilated(y, w3, (1, 1), [(0, 0), (0, 0)],
                                 dimension_numbers=dn, precision=hp)
    y = bn(y, params["bn3"])
    return x + y


if __name__ == "__main__":
    key = jax.random.PRNGKey(0)
    ks = jax.random.split(key, 16)

    N, ch, exp, H, W = 2, 4, 4, 16, 16
    mid = ch * exp

    x = jax.random.normal(ks[0], (N, ch, H, W), dtype=jnp.float32)
    params = dict(
        w1=jax.random.normal(ks[1], (mid, ch, 1, 1), jnp.float32) * 0.3,
        bn1=(0.5 + jax.random.uniform(ks[2], (mid,), jnp.float32),
             jax.random.normal(ks[3], (mid,), jnp.float32) * 0.1,
             jax.random.normal(ks[4], (mid,), jnp.float32) * 0.1,
             0.5 + jax.random.uniform(ks[5], (mid,), jnp.float32)),
        wd=jax.random.normal(ks[6], (mid, 1, 3, 3), jnp.float32) * 0.3,
        bn2=(0.5 + jax.random.uniform(ks[7], (mid,), jnp.float32),
             jax.random.normal(ks[8], (mid,), jnp.float32) * 0.1,
             jax.random.normal(ks[9], (mid,), jnp.float32) * 0.1,
             0.5 + jax.random.uniform(ks[10], (mid,), jnp.float32)),
        w3=jax.random.normal(ks[11], (ch, mid, 1, 1), jnp.float32) * 0.3,
        bn3=(0.5 + jax.random.uniform(ks[12], (ch,), jnp.float32),
             jax.random.normal(ks[13], (ch,), jnp.float32) * 0.1,
             jax.random.normal(ks[14], (ch,), jnp.float32) * 0.1,
             0.5 + jax.random.uniform(ks[15], (ch,), jnp.float32)),
    )

    fwd = jax.jit(inverted_bottleneck)
    out = jax.block_until_ready(fwd(x, params))
    ref = jax.block_until_ready(inverted_bottleneck_ref(x, params))

    assert out.shape == (N, ch, H, W), out.shape
    # Tolerance covers (a) MXU vs XLA-conv precision modes and (b) the
    # explicit choice of tanh-approximate GELU in-kernel (~1e-3 deviation from
    # torch's exact-erf GELU).  Structural bugs produce errors >> 1e-2.
    max_err = float(jnp.max(jnp.abs(out - ref)))
    assert jnp.allclose(out, ref, atol=1e-2, rtol=1e-2), max_err
    print("KERNEL_OK")
</pallas_src>

<mosaic_0001>
module attributes {stable_mosaic.version = 11 : i64} {
  func.func @inverted_bottleneck_kernel(%arg0: i32, %arg1: memref<1x4x256xf32, #tpu.memory_space<vmem>>, %arg2: memref<16x4xf32, #tpu.memory_space<vmem>>, %arg3: memref<4x16xf32, #tpu.memory_space<vmem>>, %arg4: memref<9x1x256xf32, #tpu.memory_space<vmem>>, %arg5: memref<12x16x1xf32, #tpu.memory_space<vmem>>, %arg6: memref<1x4x256xf32, #tpu.memory_space<vmem>>) attributes {dimension_semantics = [#tpu.dimension_semantics<parallel>], iteration_bounds = array<i64: 2>, scalar_prefetch = 0 : i64, scratch_operands = 0 : i64, tpu.core_type = #tpu.core_type<tc>, window_params = [{transform_indices = @transform_0, window_bounds = array<i64: 1, 4, 256>}, {pipeline_mode = #tpu.pipeline_mode<synchronous>, transform_indices = @transform_1, window_bounds = array<i64: 16, 4>}, {pipeline_mode = #tpu.pipeline_mode<synchronous>, transform_indices = @transform_2, window_bounds = array<i64: 4, 16>}, {pipeline_mode = #tpu.pipeline_mode<synchronous>, transform_indices = @transform_3, window_bounds = array<i64: 9, 1, 256>}, {pipeline_mode = #tpu.pipeline_mode<synchronous>, transform_indices = @transform_4, window_bounds = array<i64: 12, 16, 1>}, {transform_indices = @transform_5, window_bounds = array<i64: 1, 4, 256>}]} {
    %c0 = arith.constant 0 : index
    %c0_0 = arith.constant 0 : index
    %0 = vector.load %arg2[%c0, %c0_0] : memref<16x4xf32, #tpu.memory_space<vmem>>, vector<16x4xf32>
    %c0_1 = arith.constant 0 : index
    %c0_2 = arith.constant 0 : index
    %c0_3 = arith.constant 0 : index
    %1 = vector.load %arg1[%c0_1, %c0_2, %c0_3] : memref<1x4x256xf32, #tpu.memory_space<vmem>>, vector<1x4x256xf32>
    %2 = vector.shape_cast %1 : vector<1x4x256xf32> to vector<4x256xf32>
    %cst = arith.constant dense<0.000000e+00> : vector<16x256xf32>
    %3 = tpu.matmul %0, %2, %cst {dimension_numbers = #tpu.dot_dimension_numbers<[1], [0], [0], [1], [0, 0, 1, 1], [], []>} : vector<16x4xf32>, vector<4x256xf32>, vector<16x256xf32> -> vector<16x256xf32>
    %c0_4 = arith.constant 0 : index
    %c0_5 = arith.constant 0 : index
    %c0_6 = arith.constant 0 : index
    %4 = vector.load %arg5[%c0_4, %c0_5, %c0_6] : memref<12x16x1xf32, #tpu.memory_space<vmem>>, vector<1x16x1xf32>
    %5 = vector.shape_cast %4 : vector<1x16x1xf32> to vector<16x1xf32>
    %6 = vector.broadcast %5 : vector<16x1xf32> to vector<16x256xf32>
    %7 = arith.addf %3, %6 : vector<16x256xf32>
    %cst_7 = arith.constant 5.000000e-01 : f32
    %8 = vector.broadcast %cst_7 : f32 to vector<16x256xf32>
    %9 = arith.mulf %8, %7 : vector<16x256xf32>
    %cst_8 = arith.constant 4.471500e-02 : f32
    %10 = vector.broadcast %cst_8 : f32 to vector<16x256xf32>
    %11 = arith.mulf %10, %7 : vector<16x256xf32>
    %12 = arith.mulf %11, %7 : vector<16x256xf32>
    %13 = arith.mulf %12, %7 : vector<16x256xf32>
    %14 = arith.addf %7, %13 : vector<16x256xf32>
    %cst_9 = arith.constant 0.797884583 : f32
    %15 = vector.broadcast %cst_9 : f32 to vector<16x256xf32>
    %16 = arith.mulf %15, %14 : vector<16x256xf32>
    %17 = math.tanh %16 : vector<16x256xf32>
    %cst_10 = arith.constant 1.000000e+00 : f32
    %18 = vector.broadcast %cst_10 : f32 to vector<16x256xf32>
    %19 = arith.addf %18, %17 : vector<16x256xf32>
    %20 = arith.mulf %9, %19 : vector<16x256xf32>
    %cst_11 = arith.constant 0.000000e+00 : f32
    %21 = vector.broadcast %cst_11 : f32 to vector<16x256xf32>
    %c17_i32 = arith.constant 17 : i32
    %22 = tpu.dynamic_rotate %20 by %c17_i32 dim 1 : vector<16x256xf32>, i32 -> vector<16x256xf32>
    %c0_12 = arith.constant 0 : index
    %c0_13 = arith.constant 0 : index
    %c0_14 = arith.constant 0 : index
    %23 = vector.load %arg4[%c0_12, %c0_13, %c0_14] : memref<9x1x256xf32, #tpu.memory_space<vmem>>, vector<1x1x256xf32>
    %24 = vector.shape_cast %23 : vector<1x1x256xf32> to vector<1x256xf32>
    %25 = vector.broadcast %24 : vector<1x256xf32> to vector<16x256xf32>
    %26 = arith.mulf %22, %25 : vector<16x256xf32>
    %c3 = arith.constant 3 : index
    %c0_15 = arith.constant 0 : index
    %c0_16 = arith.constant 0 : index
    %27 = vector.load %arg5[%c3, %c0_15, %c0_16] : memref<12x16x1xf32, #tpu.memory_space<vmem>>, vector<1x16x1xf32>
    %28 = vector.shape_cast %27 : vector<1x16x1xf32> to vector<16x1xf32>
    %29 = vector.broadcast %28 : vector<16x1xf32> to vector<16x256xf32>
    %30 = arith.mulf %29, %26 : vector<16x256xf32>
    %31 = arith.addf %21, %30 : vector<16x256xf32>
    %c16_i32 = arith.constant 16 : i32
    %32 = tpu.dynamic_rotate %20 by %c16_i32 dim 1 : vector<16x256xf32>, i32 -> vector<16x256xf32>
    %c1 = arith.constant 1 : index
    %c0_17 = arith.constant 0 : index
    %c0_18 = arith.constant 0 : index
    %33 = vector.load %arg4[%c1, %c0_17, %c0_18] : memref<9x1x256xf32, #tpu.memory_space<vmem>>, vector<1x1x256xf32>
    %34 = vector.shape_cast %33 : vector<1x1x256xf32> to vector<1x256xf32>
    %35 = vector.broadcast %34 : vector<1x256xf32> to vector<16x256xf32>
    %36 = arith.mulf %32, %35 : vector<16x256xf32>
    %c4 = arith.constant 4 : index
    %c0_19 = arith.constant 0 : index
    %c0_20 = arith.constant 0 : index
    %37 = vector.load %arg5[%c4, %c0_19, %c0_20] : memref<12x16x1xf32, #tpu.memory_space<vmem>>, vector<1x16x1xf32>
    %38 = vector.shape_cast %37 : vector<1x16x1xf32> to vector<16x1xf32>
    %39 = vector.broadcast %38 : vector<16x1xf32> to vector<16x256xf32>
    %40 = arith.mulf %39, %36 : vector<16x256xf32>
    %41 = arith.addf %31, %40 : vector<16x256xf32>
    %c15_i32 = arith.constant 15 : i32
    %42 = tpu.dynamic_rotate %20 by %c15_i32 dim 1 : vector<16x256xf32>, i32 -> vector<16x256xf32>
    %c2 = arith.constant 2 : index
    %c0_21 = arith.constant 0 : index
    %c0_22 = arith.constant 0 : index
    %43 = vector.load %arg4[%c2, %c0_21, %c0_22] : memref<9x1x256xf32, #tpu.memory_space<vmem>>, vector<1x1x256xf32>
    %44 = vector.shape_cast %43 : vector<1x1x256xf32> to vector<1x256xf32>
    %45 = vector.broadcast %44 : vector<1x256xf32> to vector<16x256xf32>
    %46 = arith.mulf %42, %45 : vector<16x256xf32>
    %c5 = arith.constant 5 : index
    %c0_23 = arith.constant 0 : index
    %c0_24 = arith.constant 0 : index
    %47 = vector.load %arg5[%c5, %c0_23, %c0_24] : memref<12x16x1xf32, #tpu.memory_space<vmem>>, vector<1x16x1xf32>
    %48 = vector.shape_cast %47 : vector<1x16x1xf32> to vector<16x1xf32>
    %49 = vector.broadcast %48 : vector<16x1xf32> to vector<16x256xf32>
    %50 = arith.mulf %49, %46 : vector<16x256xf32>
    %51 = arith.addf %41, %50 : vector<16x256xf32>
    %c1_i32 = arith.constant 1 : i32
    %52 = tpu.dynamic_rotate %20 by %c1_i32 dim 1 : vector<16x256xf32>, i32 -> vector<16x256xf32>
    %c3_25 = arith.constant 3 : index
    %c0_26 = arith.constant 0 : index
    %c0_27 = arith.constant 0 : index
    %53 = vector.load %arg4[%c3_25, %c0_26, %c0_27] : memref<9x1x256xf32, #tpu.memory_space<vmem>>, vector<1x1x256xf32>
    %54 = vector.shape_cast %53 : vector<1x1x256xf32> to vector<1x256xf32>
    %55 = vector.broadcast %54 : vector<1x256xf32> to vector<16x256xf32>
    %56 = arith.mulf %52, %55 : vector<16x256xf32>
    %c6 = arith.constant 6 : index
    %c0_28 = arith.constant 0 : index
    %c0_29 = arith.constant 0 : index
    %57 = vector.load %arg5[%c6, %c0_28, %c0_29] : memref<12x16x1xf32, #tpu.memory_space<vmem>>, vector<1x16x1xf32>
    %58 = vector.shape_cast %57 : vector<1x16x1xf32> to vector<16x1xf32>
    %59 = vector.broadcast %58 : vector<16x1xf32> to vector<16x256xf32>
    %60 = arith.mulf %59, %56 : vector<16x256xf32>
    %61 = arith.addf %51, %60 : vector<16x256xf32>
    %c7 = arith.constant 7 : index
    %c0_30 = arith.constant 0 : index
    %c0_31 = arith.constant 0 : index
    %62 = vector.load %arg5[%c7, %c0_30, %c0_31] : memref<12x16x1xf32, #tpu.memory_space<vmem>>, vector<1x16x1xf32>
    %63 = vector.shape_cast %62 : vector<1x16x1xf32> to vector<16x1xf32>
    %64 = vector.broadcast %63 : vector<16x1xf32> to vector<16x256xf32>
    %65 = arith.mulf %64, %20 : vector<16x256xf32>
    %66 = arith.addf %61, %65 : vector<16x256xf32>
    %c255_i32 = arith.constant 255 : i32
    %67 = tpu.dynamic_rotate %20 by %c255_i32 dim 1 : vector<16x256xf32>, i32 -> vector<16x256xf32>
    %c5_32 = arith.constant 5 : index
    %c0_33 = arith.constant 0 : index
    %c0_34 = arith.constant 0 : index
    %68 = vector.load %arg4[%c5_32, %c0_33, %c0_34] : memref<9x1x256xf32, #tpu.memory_space<vmem>>, vector<1x1x256xf32>
    %69 = vector.shape_cast %68 : vector<1x1x256xf32> to vector<1x256xf32>
    %70 = vector.broadcast %69 : vector<1x256xf32> to vector<16x256xf32>
    %71 = arith.mulf %67, %70 : vector<16x256xf32>
    %c8 = arith.constant 8 : index
    %c0_35 = arith.constant 0 : index
    %c0_36 = arith.constant 0 : index
    %72 = vector.load %arg5[%c8, %c0_35, %c0_36] : memref<12x16x1xf32, #tpu.memory_space<vmem>>, vector<1x16x1xf32>
    %73 = vector.shape_cast %72 : vector<1x16x1xf32> to vector<16x1xf32>
    %74 = vector.broadcast %73 : vector<16x1xf32> to vector<16x256xf32>
    %75 = arith.mulf %74, %71 : vector<16x256xf32>
    %76 = arith.addf %66, %75 : vector<16x256xf32>
    %c241_i32 = arith.constant 241 : i32
    %77 = tpu.dynamic_rotate %20 by %c241_i32 dim 1 : vector<16x256xf32>, i32 -> vector<16x256xf32>
    %c6_37 = arith.constant 6 : index
    %c0_38 = arith.constant 0 : index
    %c0_39 = arith.constant 0 : index
    %78 = vector.load %arg4[%c6_37, %c0_38, %c0_39] : memref<9x1x256xf32, #tpu.memory_space<vmem>>, vector<1x1x256xf32>
    %79 = vector.shape_cast %78 : vector<1x1x256xf32> to vector<1x256xf32>
    %80 = vector.broadcast %79 : vector<1x256xf32> to vector<16x256xf32>
    %81 = arith.mulf %77, %80 : vector<16x256xf32>
    %c9 = arith.constant 9 : index
    %c0_40 = arith.constant 0 : index
    %c0_41 = arith.constant 0 : index
    %82 = vector.load %arg5[%c9, %c0_40, %c0_41] : memref<12x16x1xf32, #tpu.memory_space<vmem>>, vector<1x16x1xf32>
    %83 = vector.shape_cast %82 : vector<1x16x1xf32> to vector<16x1xf32>
    %84 = vector.broadcast %83 : vector<16x1xf32> to vector<16x256xf32>
    %85 = arith.mulf %84, %81 : vector<16x256xf32>
    %86 = arith.addf %76, %85 : vector<16x256xf32>
    %c240_i32 = arith.constant 240 : i32
    %87 = tpu.dynamic_rotate %20 by %c240_i32 dim 1 : vector<16x256xf32>, i32 -> vector<16x256xf32>
    %c7_42 = arith.constant 7 : index
    %c0_43 = arith.constant 0 : index
    %c0_44 = arith.constant 0 : index
    %88 = vector.load %arg4[%c7_42, %c0_43, %c0_44] : memref<9x1x256xf32, #tpu.memory_space<vmem>>, vector<1x1x256xf32>
    %89 = vector.shape_cast %88 : vector<1x1x256xf32> to vector<1x256xf32>
    %90 = vector.broadcast %89 : vector<1x256xf32> to vector<16x256xf32>
    %91 = arith.mulf %87, %90 : vector<16x256xf32>
    %c10 = arith.constant 10 : index
    %c0_45 = arith.constant 0 : index
    %c0_46 = arith.constant 0 : index
    %92 = vector.load %arg5[%c10, %c0_45, %c0_46] : memref<12x16x1xf32, #tpu.memory_space<vmem>>, vector<1x16x1xf32>
    %93 = vector.shape_cast %92 : vector<1x16x1xf32> to vector<16x1xf32>
    %94 = vector.broadcast %93 : vector<16x1xf32> to vector<16x256xf32>
    %95 = arith.mulf %94, %91 : vector<16x256xf32>
    %96 = arith.addf %86, %95 : vector<16x256xf32>
    %c239_i32 = arith.constant 239 : i32
    %97 = tpu.dynamic_rotate %20 by %c239_i32 dim 1 : vector<16x256xf32>, i32 -> vector<16x256xf32>
    %c8_47 = arith.constant 8 : index
    %c0_48 = arith.constant 0 : index
    %c0_49 = arith.constant 0 : index
    %98 = vector.load %arg4[%c8_47, %c0_48, %c0_49] : memref<9x1x256xf32, #tpu.memory_space<vmem>>, vector<1x1x256xf32>
    %99 = vector.shape_cast %98 : vector<1x1x256xf32> to vector<1x256xf32>
    %100 = vector.broadcast %99 : vector<1x256xf32> to vector<16x256xf32>
    %101 = arith.mulf %97, %100 : vector<16x256xf32>
    %c11 = arith.constant 11 : index
    %c0_50 = arith.constant 0 : index
    %c0_51 = arith.constant 0 : index
    %102 = vector.load %arg5[%c11, %c0_50, %c0_51] : memref<12x16x1xf32, #tpu.memory_space<vmem>>, vector<1x16x1xf32>
    %103 = vector.shape_cast %102 : vector<1x16x1xf32> to vector<16x1xf32>
    %104 = vector.broadcast %103 : vector<16x1xf32> to vector<16x256xf32>
    %105 = arith.mulf %104, %101 : vector<16x256xf32>
    %106 = arith.addf %96, %105 : vector<16x256xf32>
    %c1_52 = arith.constant 1 : index
    %c0_53 = arith.constant 0 : index
    %c0_54 = arith.constant 0 : index
    %107 = vector.load %arg5[%c1_52, %c0_53, %c0_54] : memref<12x16x1xf32, #tpu.memory_space<vmem>>, vector<1x16x1xf32>
    %108 = vector.shape_cast %107 : vector<1x16x1xf32> to vector<16x1xf32>
    %109 = vector.broadcast %108 : vector<16x1xf32> to vector<16x256xf32>
    %110 = arith.addf %106, %109 : vector<16x256xf32>
    %cst_55 = arith.constant 5.000000e-01 : f32
    %111 = vector.broadcast %cst_55 : f32 to vector<16x256xf32>
    %112 = arith.mulf %111, %110 : vector<16x256xf32>
    %cst_56 = arith.constant 4.471500e-02 : f32
    %113 = vector.broadcast %cst_56 : f32 to vector<16x256xf32>
    %114 = arith.mulf %113, %110 : vector<16x256xf32>
    %115 = arith.mulf %114, %110 : vector<16x256xf32>
    %116 = arith.mulf %115, %110 : vector<16x256xf32>
    %117 = arith.addf %110, %116 : vector<16x256xf32>
    %cst_57 = arith.constant 0.797884583 : f32
    %118 = vector.broadcast %cst_57 : f32 to vector<16x256xf32>
    %119 = arith.mulf %118, %117 : vector<16x256xf32>
    %120 = math.tanh %119 : vector<16x256xf32>
    %cst_58 = arith.constant 1.000000e+00 : f32
    %121 = vector.broadcast %cst_58 : f32 to vector<16x256xf32>
    %122 = arith.addf %121, %120 : vector<16x256xf32>
    %123 = arith.mulf %112, %122 : vector<16x256xf32>
    %c0_59 = arith.constant 0 : index
    %c0_60 = arith.constant 0 : index
    %124 = vector.load %arg3[%c0_59, %c0_60] : memref<4x16xf32, #tpu.memory_space<vmem>>, vector<4x16xf32>
    %cst_61 = arith.constant dense<0.000000e+00> : vector<4x256xf32>
    %125 = tpu.matmul %124, %123, %cst_61 {dimension_numbers = #tpu.dot_dimension_numbers<[1], [0], [0], [1], [0, 0, 1, 1], [], []>} : vector<4x16xf32>, vector<16x256xf32>, vector<4x256xf32> -> vector<4x256xf32>
    %c2_62 = arith.constant 2 : index
    %c0_63 = arith.constant 0 : index
    %c0_64 = arith.constant 0 : index
    %126 = vector.load %arg5[%c2_62, %c0_63, %c0_64] : memref<12x16x1xf32, #tpu.memory_space<vmem>>, vector<1x16x1xf32>
    %127 = vector.shape_cast %126 : vector<1x16x1xf32> to vector<16x1xf32>
    %128 = vector.extract_strided_slice %127 {offsets = [0, 0], sizes = [4, 1], strides = [1, 1]} : vector<16x1xf32> to vector<4x1xf32>
    %c0_65 = arith.constant 0 : index
    %c0_66 = arith.constant 0 : index
    %c0_67 = arith.constant 0 : index
    %129 = vector.load %arg1[%c0_65, %c0_66, %c0_67] : memref<1x4x256xf32, #tpu.memory_space<vmem>>, vector<1x4x256xf32>
    %130 = vector.shape_cast %129 : vector<1x4x256xf32> to vector<4x256xf32>
    %131 = arith.addf %130, %125 : vector<4x256xf32>
    %132 = vector.broadcast %128 : vector<4x1xf32> to vector<4x256xf32>
    %133 = arith.addf %131, %132 : vector<4x256xf32>
    %c0_68 = arith.constant 0 : index
    %c0_69 = arith.constant 0 : index
    %c0_70 = arith.constant 0 : index
    %134 = vector.load %arg6[%c0_68, %c0_69, %c0_70] : memref<1x4x256xf32, #tpu.memory_space<vmem>>, vector<1x4x256xf32>
    %135 = vector.shape_cast %134 : vector<1x4x256xf32> to vector<4x256xf32>
    %136 = vector.shape_cast %133 : vector<4x256xf32> to vector<1x4x256xf32>
    tpu.vector_store %arg6[%c0_68, %c0_69, %c0_70], %136 {strides = array<i32>} : memref<1x4x256xf32, #tpu.memory_space<vmem>>, vector<1x4x256xf32>,
    return
  }
  func.func @transform_0(%arg0: i32) -> (i32, i32, i32) {
    %c0_i32 = arith.constant 0 : i32
    %c0_i32_0 = arith.constant 0 : i32
    %c0_i32_1 = arith.constant 0 : i32
    return %arg0, %c0_i32, %c0_i32_0 : i32, i32, i32
  }
  func.func @transform_1(%arg0: i32) -> (i32, i32) {
    %c0_i32 = arith.constant 0 : i32
    %c0_i32_0 = arith.constant 0 : i32
    %c0_i32_1 = arith.constant 0 : i32
    return %c0_i32, %c0_i32_0 : i32, i32
  }
  func.func @transform_2(%arg0: i32) -> (i32, i32) {
    %c0_i32 = arith.constant 0 : i32
    %c0_i32_0 = arith.constant 0 : i32
    %c0_i32_1 = arith.constant 0 : i32
    return %c0_i32, %c0_i32_0 : i32, i32
  }
  func.func @transform_3(%arg0: i32) -> (i32, i32, i32) {
    %c0_i32 = arith.constant 0 : i32
    %c0_i32_0 = arith.constant 0 : i32
    %c0_i32_1 = arith.constant 0 : i32
    %c0_i32_2 = arith.constant 0 : i32
    return %c0_i32, %c0_i32_0, %c0_i32_1 : i32, i32, i32
  }
  func.func @transform_4(%arg0: i32) -> (i32, i32, i32) {
    %c0_i32 = arith.constant 0 : i32
    %c0_i32_0 = arith.constant 0 : i32
    %c0_i32_1 = arith.constant 0 : i32
    %c0_i32_2 = arith.constant 0 : i32
    return %c0_i32, %c0_i32_0, %c0_i32_1 : i32, i32, i32
  }
  func.func @transform_5(%arg0: i32) -> (i32, i32, i32) {
    %c0_i32 = arith.constant 0 : i32
    %c0_i32_0 = arith.constant 0 : i32
    %c0_i32_1 = arith.constant 0 : i32
    return %arg0, %c0_i32, %c0_i32_0 : i32, i32, i32
  }
}

</mosaic_0001>

<bundles_post_ra>
// kernel: squeeze.4
= control target key start
LH: loop header
LB: loop body
LE: loop exit
PB: predicated region body
PF: predicated region fallthrough
CT: control target
= control target key end

     0   :  { %vm15_vm0 = vcmask 130048   ;;  %s59_s0 = inlined_call_operand.vmem [shape: f32[16,3,3], index: 0, kind: input, shape index: {}]   ;;  %s60_s1 = inlined_call_operand.vmem [shape: f32[16,9], index: 1, kind: output, shape index: {}]  }
   0x1   :  { %v27_v0 = vld [vmem:[%s59_s0 + $0x8] sm:$0xf]  ;;  %v28_v1 = vld [vmem:[%s59_s0 + $0x4] sm:$0xf]  ;;  %v12_v2 = vld [vmem:[%s59_s0] sm:$0xf] }
   0x2   :  { %7 = vst [vmem:[#allocation0] sm:$0xf] %v27_v0 }
   0x3   :  { %11 = vst [vmem:[#allocation0 + $0x10] sm:$0xf] %v28_v1 }
   0x4   :  { %13 = vst [vmem:[#allocation0 + $0x8] sm:$0xf] %v12_v2 }
   0x9   :  { %v23_v3 = vld [vmem:[#allocation0] sm:$0x7]  }
   0xa   :  { %v18_v4 = vld [vmem:[#allocation0 + $0x10] sm:$0x7]   ;;  %30 = vst.msk [vmem:[%s60_s1 + $0x6] sm:$0x7] %vm15_vm0, %v23_v3  }
   0xb   :  { %v14_v5 = vld [vmem:[#allocation0 + $0x8] sm:$0x7]   ;;  %29 = vst.msk [vmem:[%s60_s1 + $0x3] sm:$0x7] %vm15_vm0, %v18_v4  }
   0xc   :  { %16 = vst.msk [vmem:[%s60_s1] sm:$0x7] %vm15_vm0, %v14_v5  }

// kernel: inverted_bottleneck.1
= control target key start
LH: loop header
LB: loop body
LE: loop exit
PB: predicated region body
PF: predicated region fallthrough
CT: control target
= control target key end

     0   :  { %s1026_s18 = smov 0   ;;  %s1467_s0 = inlined_call_operand.vmem [shape: f32[2,4,256], index: 0, kind: input, shape index: {}]   ;;  %s1468_s1 = inlined_call_operand.vmem [shape: f32[16,4], index: 1, kind: input, shape index: {}]   ;;  %s1469_s2 = inlined_call_operand.vmem [shape: f32[4,16], index: 2, kind: input, shape index: {}]   ;;  %s1470_s3 = inlined_call_operand.vmem [shape: f32[9,1,256], index: 3, kind: input, shape index: {}]   ;;  %s1471_s4 = inlined_call_operand.vmem [shape: f32[12,16,1], index: 4, kind: input, shape index: {}]   ;;  %s1472_s5 = inlined_call_operand.vmem [shape: f32[2,4,256], index: 5, kind: output, shape index: {}]  }
   0x1 LB: > { %s892_s19 = sadd.s32 4294967295, %s984_s18   ;;  %p896_p0 = scmp.ge.s32.totalorder %s984_s18, 1  ;;  %s984_s18 = sphi %s1026_s18, %s15_s18  }
   0x2   : > { %p187_p1 = scmp.lt.s32.totalorder %s984_s18, 3 }
   0x4   : > { %p188_p2 = pnand %p896_p0, %p187_p1 }
   0x5   : > { %p215_p3 = scmp.lt.s32.totalorder (!%p188_p2), %s892_s19, 1  ;;  %s987_s17 = smov (!%p188_p2), 16  }
   0x6   : > { %191 = sbr.rel (%p188_p2) target bundleno = 549 (0x225), region = 40  ;;  %s988_s20 = smov (!%p188_p2), 17  }
   0x7   : > { %s989_s21 = smov (!%p188_p2), 15   ;;  %s990_s22 = smov (!%p188_p2), 1  }
   0x8   : > { %s991_s23 = smov (!%p188_p2), 127   ;;  %s992_s25 = smov (!%p188_p2), 113  }
   0x9   : > { %s993_s26 = smov (!%p188_p2), 112  }
   0xb   : > { %v229_v0 = vld [vmem:[%s1471_s4 + $0x8] sm:$0xff]  ;;  %v986_v1 = vmov 0   ;;  %s1474_s19 = smov (!%p215_p3, %s892_s19), 1  ;;  %v228_v4 = vld [vmem:[%s1471_s4] sm:$0xff]  ;;  %vm251_vm0 = vcmask 1043456   ;;  %vm244_vm1 = vcmask 31744  }
   0xc   : > { %959 = vset.pattern.permute.xlu0 %v986_v1  ;;  %960 = vset.pattern.permute.xlu1 %v986_v1  ;;  %v911_v2 = vld [vmem:[%s1471_s4 + $0x48] sm:$0xff]  ;;  %s939_s24 = sshll.u32 %s1474_s19, 3  ;;  %v910_v5 = vld [vmem:[%s1471_s4 + $0x40] sm:$0xff]  ;;  %v908_v9 = vld [vmem:[%s1471_s4 + $0x38] sm:$0xff]  ;;  %vm774_vm10 = vcmask 130048  }
   0xd   : > { %237 = vperm.xlu0 %959, %v229_v0   ;;  %961 = vset.pattern.permute.xlu2 %v986_v1  ;;  %s219_s27 = scalar_lea.vmem %s1467_s0, %s939_s24  ;;  %v225_v6 = vld [vmem:[%s1468_s1] sm:$0xff]  ;;  %v919_v10 = vld [vmem:[%s1471_s4 + $0x78] sm:$0xff]  ;;  %v226_v11 = vld [vmem:[%s1468_s1 + $0x8] sm:$0xff]  ;;  %s224_s11 = scalar_lea.vmem %s1472_s5, %s939_s24 }
   0xe   : > { %418 = vperm.xlu1 %960, %v911_v2   ;;  %v1048_v3 = vld [vmem:[%s219_s27] sm:$0xff]  ;;  %v907_v12 = vld [vmem:[%s1471_s4 + $0x30] sm:$0xff]  ;;  %v917_v13 = vld [vmem:[%s1471_s4 + $0x68] sm:$0xff]  ;;  %s994_s27 = smov 111  }
   0xf   : > { %241 = vst [vmem:[#allocation1] ss:$2 sm:$0xff] %v1048_v3  ;;  %v922_v14 = vld [vmem:[%s1471_s4 + $0x88] sm:$0xff]  ;;  %v916_v15 = vld [vmem:[%s1471_s4 + $0x60] sm:$0xff]  ;;  %v925_v16 = vld [vmem:[%s1471_s4 + $0x98] sm:$0xff] }
  0x10   : > { %v918_v17 = vld [vmem:[%s1471_s4 + $0x70] sm:$0xff]  ;;  %v928_v18 = vld [vmem:[%s1471_s4 + $0xa8] sm:$0xff]  ;;  %v921_v19 = vld [vmem:[%s1471_s4 + $0x80] sm:$0xff] }
  0x11   : > { %v924_v20 = vld [vmem:[%s1471_s4 + $0x90] sm:$0xff]  ;;  %v927_v21 = vld [vmem:[%s1471_s4 + $0xa0] sm:$0xff]  ;;  %v914_v22 = vld [vmem:[%s1471_s4 + $0x58] sm:$0xff] }
  0x12   : > { %463 = vperm.xlu2 %961, %v914_v22   ;;  %v913_v24 = vld [vmem:[%s1471_s4 + $0x50] sm:$0xff]  ;;  %v933_v22 = vld [vmem:[%s1471_s4 + $0x18] sm:$0xff] }
  0x15   : > { %232 = vperm.xlu0 %959, %v228_v4  }
  0x16   : > { %413 = vperm.xlu1 %960, %v910_v5   ;;  %v242_v7 = vld.sshfl [vmem:[#allocation1] sm:$0xff pattern:$0x75316420]  ;;  %v243_v8 = vld.sshfl [vmem:[#allocation1 + $0x8] sm:$0xff pattern:$0x75316420] }
  0x17   : > { %901 = vmatpush.msk.msra.mxu0 %vm251_vm0, %v242_v7  ;;  %904 = vmatpush.msk.msra.mxu1 %vm251_vm0, %v243_v8 }
  0x18   : > { %902 = vmatmul.msk.f32.vlgmr.msra.gmra.mxu0 %vm244_vm1, %v225_v6  ;;  %905 = vmatmul.msk.f32.vlgmr.msra.gmra.mxu1 %vm244_vm1, %v225_v6 }
  0x1a   : > { %458 = vperm.xlu2 %961, %v913_v24  }
  0x1d   : > { %373 = vperm.xlu0 %959, %v908_v9  }
  0x1e   : > { %529 = vperm.xlu1 %960, %v919_v10  }
  0x20   : > { %903 = vmatmul.msk.f32.gmra.mxu0 %vm244_vm1, %v226_v11  ;;  %906 = vmatmul.msk.f32.gmra.mxu1 %vm244_vm1, %v226_v11 }
  0x25   : > { %368 = vperm.xlu0 %959, %v907_v12  }
  0x26   : > { %574 = vperm.xlu1 %960, %v922_v14  }
  0x2d   : > { %508 = vperm.xlu0 %959, %v917_v13  }
  0x2e   : > { %619 = vperm.xlu1 %960, %v925_v16  }
  0x35   : > { %503 = vperm.xlu0 %959, %v916_v15  }
  0x36   : > { %664 = vperm.xlu1 %960, %v928_v18   ;;  %v930_v18 = vld [vmem:[%s1471_s4 + $0xb0] sm:$0xff] }
  0x3d   : > { %524 = vperm.xlu0 %959, %v918_v17  }
  0x3e   : > { %659 = vperm.xlu1 %960, %v927_v21  }
  0x45   : > { %569 = vperm.xlu0 %959, %v921_v19   ;;  %v936_v19 = vld [vmem:[%s1471_s4 + $0x20] sm:$0xff] }
  0x4d   : > { %614 = vperm.xlu0 %959, %v924_v20  }
  0x6c   : > { %v1161_v20 = vpop.permute.xlu2 %463 }
  0x7f   : > { %v238_v23 = vpop.permute.xlu0 %237 }
  0x80   : > { %v1113_v45 = vpop.permute.xlu1 %418 }
  0x87   : > { %v233_v25 = vpop.permute.xlu0 %232 }
  0x88   : > { %v1117_v60 = vpop.permute.xlu1 %413 }
  0x8f   : > { %v1107_v26 = vpop.permute.xlu0 %373 }
  0x90   : > { %v1124_v11 = vpop.permute.xlu1 %529 }
  0x95   : > { %v273_v28 = vpop.f32.mrf.mxu0  ;;  %v296_v29 = vpop.f32.mrf.mxu1 }
  0x96   : > { %v274_v30 = vadd.f32 %v273_v28, %v233_v25  ;;  %v297_v31 = vadd.f32 %v296_v29, %v233_v25 }
  0x97   : > { %v1109_v27 = vpop.permute.xlu0 %368 }
  0x98   : > { %v306_v32 = vmul.f32 0.044715, %v274_v30  ;;  %v307_v33 = vmul.f32 0.044715, %v297_v31  ;;  %v302_v57 = vmul.f32 0.5, %v274_v30  ;;  %v303_v61 = vmul.f32 0.5, %v297_v31  ;;  %v1166_v21 = vpop.permute.xlu1 %574 }
  0x9a   : > { %v310_v34 = vmul.f32 %v306_v32, %v274_v30  ;;  %v311_v35 = vmul.f32 %v307_v33, %v297_v31 }
  0x9c   : > { %v314_v36 = vmul.f32 %v310_v34, %v274_v30  ;;  %v315_v37 = vmul.f32 %v311_v35, %v297_v31  ;;  %v346_v34 = vlaneseq  ;;  %v931_v35 = vld [vmem:[%s1471_s4 + $0xb8] sm:$0xff] }
  0x9d   : > { %v276_v39 = vpop.f32.mrf.mxu0  ;;  %v299_v40 = vpop.f32.mrf.mxu1 }
  0x9e   : > { %v318_v41 = vadd.f32 %v314_v36, %v274_v30  ;;  %v319_v42 = vadd.f32 %v315_v37, %v297_v31  ;;  %v277_v43 = vadd.f32 %v276_v39, %v238_v23  ;;  %v300_v44 = vadd.f32 %v299_v40, %v238_v23  ;;  %v459_v23 = vpop.permute.xlu2 %458 }
  0x9f   : > { %v1111_v38 = vpop.permute.xlu0 %508  ;;  %v1194_v36 = vand.u32 127, %v346_v34 }
  0xa0   : > { %v322_v46 = vmul.f32 0.7978846, %v318_v41  ;;  %v323_v47 = vmul.f32 0.7978846, %v319_v42  ;;  %v308_v48 = vmul.f32 0.044715, %v277_v43  ;;  %v1173_v24 = vpop.permute.xlu1 %619 }
  0xa1   : > { %v309_v50 = vmul.f32 0.044715, %v300_v44  ;;  %v304_v8 = vmul.f32 0.5, %v277_v43  ;;  %v305_v16 = vmul.f32 0.5, %v300_v44  ;;  %v1201_v41 = vld [vmem:[%s1470_s3] sm:$0x3] }
  0xa2   : > { %962 = vtanh.f32 %v322_v46  ;;  %v312_v49 = vmul.f32 %v308_v48, %v277_v43  ;;  %vm348_vm2 = vcmp.lt.s32.totalorder %v1194_v36, 17  ;;  %v932_v42 = vld [vmem:[%s1471_s4 + $0x10] sm:$0xff]  ;;  %vm392_vm3 = vcmp.lt.s32.totalorder %v1194_v36, 16 }
  0xa3   : > { %964 = vtanh.f32 %v323_v47  ;;  %v313_v54 = vmul.f32 %v309_v50, %v300_v44  ;;  %vm437_vm4 = vcmp.lt.s32.totalorder %v1194_v36, 15  ;;  %vm482_vm5 = vcmp.lt.s32.totalorder %v1194_v36, 1 }
  0xa4   : > { %v316_v52 = vmul.f32 %v312_v49, %v277_v43  ;;  %vm548_vm6 = vcmp.lt.s32.totalorder %v1194_v36, 127  ;;  %vm593_vm7 = vcmp.lt.s32.totalorder %v1194_v36, 113  ;;  %vm638_vm8 = vcmp.lt.s32.totalorder %v1194_v36, 112 }
  0xa5   : > { %v317_v0 = vmul.f32 %v313_v54, %v300_v44  ;;  %vm683_vm9 = vcmp.lt.s32.totalorder %v1194_v36, 111 }
  0xa6   : > { %v320_v53 = vadd.f32 %v316_v52, %v277_v43  ;;  %v1210_v43 = vld [vmem:[%s1470_s3 + $0x2] sm:$0x3] }
  0xa7   : > { %v1115_v51 = vpop.permute.xlu0 %503  ;;  %v321_v6 = vadd.f32 %v317_v0, %v300_v44  ;;  %v356_v44 = vperm.slane %v1201_v41, 1  ;;  %v401_v47 = vperm.slane %v1210_v43, 1  ;;  %v400_v50 = vperm.slane %v1210_v43, 0 }
  0xa8   : > { %v963_v55 = vpop.eup %962  ;;  %v324_v59 = vmul.f32 0.7978846, %v320_v53  ;;  %v1181_v29 = vpop.permute.xlu1 %664 }
  0xa9   : > { %v965_v56 = vpop.eup %964  ;;  %v330_v58 = vadd.f32 1.0, %v963_v55  ;;  %v325_v10 = vmul.f32 0.7978846, %v321_v6 }
  0xaa   : > { %v331_v62 = vadd.f32 1.0, %v965_v56  ;;  %966 = vtanh.f32 %v324_v59  ;;  %v355_v56 = vperm.slane %v1201_v41, 0  ;;  %v1234_v59 = vld [vmem:[%s1470_s3 + $0x4] sm:$0x3] }
  0xab   : > { %v334_v63 = vmul.f32 %v330_v58, %v302_v57  ;;  %968 = vtanh.f32 %v325_v10  ;;  %v446_v6 = vperm.slane %v1234_v59, 1 }
  0xac   : > { %v335_v1 = vmul.f32 %v331_v62, %v303_v61 }
  0xad   : > { %384 = vrot.lane.b32.xlu2 %v334_v63, %s987_s17  ;;  %338 = vrot.lane.b32.xlu0 %v334_v63, %s988_s20 }
  0xae   : > { %342 = vrot.lane.b32.xlu1 %v335_v1, %s988_s20 }
  0xaf   : > { %v525_v2 = vpop.permute.xlu0 %524 }
  0xb0   : > { %v1119_v4 = vmul.f32 %v525_v2, %v334_v63  ;;  %v1122_v5 = vmul.f32 %v525_v2, %v335_v1  ;;  %v967_v7 = vpop.eup %966  ;;  %v1189_v33 = vpop.permute.xlu1 %659  ;;  %v445_v2 = vperm.slane %v1234_v59, 0 }
  0xb1   : > { %v332_v9 = vadd.f32 1.0, %v967_v7  ;;  %v969_v14 = vpop.eup %968 }
  0xb2   : > { %v333_v15 = vadd.f32 1.0, %v969_v14 }
  0xb3   : > { %v336_v12 = vmul.f32 %v332_v9, %v304_v8 }
  0xb4   : > { %v1134_v17 = vmul.f32 %v333_v15, %v305_v16 }
  0xb5   : > { %429 = vrot.lane.b32.xlu2 %v334_v63, %s989_s21  ;;  %388 = vrot.lane.b32.xlu0 %v335_v1, %s987_s17  ;;  %v1129_v13 = vmul.f32 %v1124_v11, %v336_v12 }
  0xb6   : > { %478 = vrot.lane.b32.xlu1 %v335_v1, %s990_s22 }
  0xb7   : > { %v1177_v28 = vpop.permute.xlu0 %569 }
  0xbd   : > { %540 = vrot.lane.b32.xlu2 %v334_v63, %s991_s23  ;;  %433 = vrot.lane.b32.xlu0 %v335_v1, %s989_s21 }
  0xbe   : > { %340 = vrot.lane.b32.xlu1 %v336_v12, %s988_s20 }
  0xbf   : > { %v1185_v31 = vpop.permute.xlu0 %614 }
  0xc5   : > { %585 = vrot.lane.b32.xlu2 %v334_v63, %s992_s25  ;;  %474 = vrot.lane.b32.xlu0 %v334_v63, %s990_s22 }
  0xc6   : > { %344 = vrot.lane.b32.xlu1 %v1134_v17, %s988_s20 }
  0xcd   : > { %630 = vrot.lane.b32.xlu2 %v334_v63, %s993_s26  ;;  %544 = vrot.lane.b32.xlu0 %v335_v1, %s991_s23 }
  0xce   : > { %431 = vrot.lane.b32.xlu1 %v336_v12, %s989_s21 }
  0xd5   : > { %675 = vrot.lane.b32.xlu2 %v334_v63, %s994_s27  ;;  %589 = vrot.lane.b32.xlu0 %v335_v1, %s992_s25 }
  0xd6   : > { %476 = vrot.lane.b32.xlu1 %v336_v12, %s990_s22 }
  0xdd   : > { %386 = vrot.lane.b32.xlu2 %v336_v12, %s987_s17  ;;  %634 = vrot.lane.b32.xlu0 %v335_v1, %s993_s26 }
  0xde   : > { %542 = vrot.lane.b32.xlu1 %v336_v12, %s991_s23 }
  0xe5   : > { %390 = vrot.lane.b32.xlu2 %v1134_v17, %s987_s17  ;;  %679 = vrot.lane.b32.xlu0 %v335_v1, %s994_s27 }
  0xe6   : > { %587 = vrot.lane.b32.xlu1 %v336_v12, %s992_s25 }
  0xed   : > { %435 = vrot.lane.b32.xlu2 %v1134_v17, %s989_s21  ;;  %704 = vperm.xlu0 %959, %v930_v18  }
  0xee   : > { %632 = vrot.lane.b32.xlu1 %v336_v12, %s993_s26 }
  0xf5   : > { %480 = vrot.lane.b32.xlu2 %v1134_v17, %s990_s22  ;;  %828 = vperm.xlu0 %959, %v936_v19  }
  0xf6   : > { %677 = vrot.lane.b32.xlu1 %v336_v12, %s994_s27 }
  0xfd   : > { %546 = vrot.lane.b32.xlu2 %v1134_v17, %s991_s23 }
  0xfe   : > { %730 = vperm.xlu1 %960, %v933_v22  }
 0x105   : > { %591 = vrot.lane.b32.xlu2 %v1134_v17, %s992_s25 }
 0x107   : > { %v385_v25 = vpop.permute.xlu2 %384 }
 0x10d   : > { %636 = vrot.lane.b32.xlu2 %v1134_v17, %s993_s26 }
 0x10f   : > { %v430_v30 = vpop.permute.xlu2 %429 }
 0x115   : > { %681 = vrot.lane.b32.xlu2 %v1134_v17, %s994_s27 }
 0x117   : > { %v1187_v32 = vpop.permute.xlu2 %540 }
 0x11d   : > { %709 = vperm.xlu2 %961, %v931_v35  }
 0x11f   : > { %v1196_v37 = vpop.permute.xlu2 %585  ;;  %v339_v39 = vpop.permute.xlu0 %338 }
 0x120   : > { %v343_v40 = vpop.permute.xlu1 %342 }
 0x121   : > { %v349_v46 = vsel %vm348_vm2, %v339_v39, %v343_v40  ;;  %v351_v58 = vsel %vm348_vm2, %v343_v40, %v339_v39 }
 0x122   : > { %v360_v48 = vmul.f32 %v356_v44, %v349_v46  ;;  %v359_v0 = vmul.f32 %v355_v56, %v351_v58 }
 0x124   : > { %v377_v61 = vmul.f32 %v1109_v27, %v360_v48  ;;  %v376_v15 = vmul.f32 %v1109_v27, %v359_v0 }
 0x125   : > { %725 = vperm.xlu2 %961, %v932_v42  }
 0x127   : > { %v1219_v49 = vpop.permute.xlu2 %630  ;;  %v389_v52 = vpop.permute.xlu0 %388 }
 0x128   : > { %v479_v53 = vpop.permute.xlu1 %478  ;;  %v393_v54 = vsel %vm392_vm3, %v385_v25, %v389_v52  ;;  %v395_v55 = vsel %vm392_vm3, %v389_v52, %v385_v25 }
 0x129   : > { %v405_v57 = vmul.f32 %v401_v47, %v393_v54  ;;  %v404_v62 = vmul.f32 %v400_v50, %v395_v55  ;;  %v1282_v54 = vld [vmem:[%s1470_s3 + $0xa] sm:$0x3] }
 0x12b   : > { %v422_v63 = vmul.f32 %v1117_v60, %v405_v57  ;;  %v421_v7 = vmul.f32 %v1117_v60, %v404_v62  ;;  %v1262_v60 = vld [vmem:[%s1470_s3 + $0x6] sm:$0x3]  ;;  %v557_v62 = vperm.slane %v1282_v54, 1 }
 0x12c   : > { %v490_v27 = vperm.slane %v1262_v60, 0  ;;  %v491_v35 = vperm.slane %v1262_v60, 1 }
 0x12d   : > { %v426_v1 = vadd.f32 %v422_v63, %v377_v61  ;;  %v425_v19 = vadd.f32 %v421_v7, %v376_v15 }
 0x12f   : > { %v1246_v8 = vpop.permute.xlu2 %675  ;;  %v434_v9 = vpop.permute.xlu0 %433 }
 0x130   : > { %v1248_v10 = vpop.permute.xlu1 %340  ;;  %v438_v12 = vsel %vm437_vm4, %v430_v30, %v434_v9  ;;  %v440_v14 = vsel %vm437_vm4, %v434_v9, %v430_v30 }
 0x131   : > { %v449_v16 = vmul.f32 %v445_v2, %v440_v14  ;;  %v450_v18 = vmul.f32 %v446_v6, %v438_v12 }
 0x133   : > { %v466_v22 = vmul.f32 %v459_v23, %v449_v16  ;;  %v467_v25 = vmul.f32 %v459_v23, %v450_v18 }
 0x135   : > { %v470_v34 = vadd.f32 %v466_v22, %v425_v19  ;;  %v471_v30 = vadd.f32 %v467_v25, %v426_v1 }
 0x137   : > { %v1267_v39 = vpop.permute.xlu2 %386  ;;  %v475_v40 = vpop.permute.xlu0 %474 }
 0x138   : > { %v1269_v42 = vpop.permute.xlu1 %344  ;;  %v483_v46 = vsel %vm482_vm5, %v475_v40, %v479_v53  ;;  %v485_v48 = vsel %vm482_vm5, %v479_v53, %v475_v40  ;;  %v556_v53 = vperm.slane %v1282_v54, 0 }
 0x139   : > { %v494_v23 = vmul.f32 %v490_v27, %v485_v48  ;;  %v495_v52 = vmul.f32 %v491_v35, %v483_v46 }
 0x13b   : > { %v511_v55 = vmul.f32 %v1115_v51, %v494_v23  ;;  %v512_v57 = vmul.f32 %v1115_v51, %v495_v52  ;;  %v1324_v23 = vld [vmem:[%s1470_s3 + $0xe] sm:$0x3] }
 0x13d   : > { %v515_v58 = vadd.f32 %v511_v55, %v470_v34  ;;  %v516_v61 = vadd.f32 %v512_v57, %v471_v30  ;;  %v647_v57 = vperm.slane %v1324_v23, 1 }
 0x13f   : > { %v391_v63 = vpop.permute.xlu2 %390  ;;  %v537_v0 = vadd.f32 %v1122_v5, %v516_v61  ;;  %v545_v1 = vpop.permute.xlu0 %544  ;;  %v536_v7 = vadd.f32 %v1119_v4, %v515_v58  ;;  %v1304_v5 = vld [vmem:[%s1470_s3 + $0xc] sm:$0x3] }
 0x140   : > { %v432_v9 = vpop.permute.xlu1 %431  ;;  %v549_v12 = vsel %vm548_vm6, %v1187_v32, %v545_v1  ;;  %v551_v51 = vsel %vm548_vm6, %v545_v1, %v1187_v32  ;;  %v601_v32 = vperm.slane %v1304_v5, 0  ;;  %v602_v22 = vperm.slane %v1304_v5, 1 }
 0x141   : > { %v560_v14 = vmul.f32 %v556_v53, %v549_v12  ;;  %v561_v15 = vmul.f32 %v557_v62, %v551_v51 }
 0x143   : > { %v577_v4 = vmul.f32 %v1177_v28, %v560_v14  ;;  %v578_v16 = vmul.f32 %v1177_v28, %v561_v15 }
 0x145   : > { %v581_v18 = vadd.f32 %v577_v4, %v536_v7  ;;  %v582_v19 = vadd.f32 %v578_v16, %v537_v0 }
 0x147   : > { %v436_v25 = vpop.permute.xlu2 %435  ;;  %v590_v34 = vpop.permute.xlu0 %589 }
 0x148   : > { %v594_v30 = vsel %vm593_vm7, %v1196_v37, %v590_v34  ;;  %v596_v40 = vsel %vm593_vm7, %v590_v34, %v1196_v37  ;;  %v477_v46 = vpop.permute.xlu1 %476  ;;  %v646_v37 = vperm.slane %v1324_v23, 0  ;;  %v1346_v34 = vld [vmem:[%s1470_s3 + $0x10] sm:$0x3] }
 0x149   : > { %v605_v28 = vmul.f32 %v601_v32, %v594_v30  ;;  %v606_v48 = vmul.f32 %v602_v22, %v596_v40  ;;  %v691_v30 = vperm.slane %v1346_v34, 0  ;;  %v692_v40 = vperm.slane %v1346_v34, 1 }
 0x14b   : > { %v622_v52 = vmul.f32 %v1185_v31, %v605_v28  ;;  %v623_v55 = vmul.f32 %v1185_v31, %v606_v48 }
 0x14d   : > { %v626_v58 = vadd.f32 %v622_v52, %v581_v18  ;;  %v627_v61 = vadd.f32 %v623_v55, %v582_v19 }
 0x14f   : > { %v481_v0 = vpop.permute.xlu2 %480  ;;  %v635_v1 = vpop.permute.xlu0 %634 }
 0x150   : > { %v639_v7 = vsel %vm638_vm8, %v1219_v49, %v635_v1  ;;  %v641_v12 = vsel %vm638_vm8, %v635_v1, %v1219_v49  ;;  %v543_v14 = vpop.permute.xlu1 %542 }
 0x151   : > { %v650_v31 = vmul.f32 %v646_v37, %v639_v7  ;;  %v651_v51 = vmul.f32 %v647_v57, %v641_v12 }
 0x153   : > { %v667_v15 = vmul.f32 %v1189_v33, %v650_v31  ;;  %v668_v4 = vmul.f32 %v1189_v33, %v651_v51  ;;  %v352_v51 = vsel %vm348_vm2, %v1269_v42, %v1248_v10 }
 0x155   : > { %v671_v16 = vadd.f32 %v667_v15, %v626_v58  ;;  %v672_v18 = vadd.f32 %v668_v4, %v627_v61  ;;  %v394_v58 = vsel %vm392_vm3, %v1267_v39, %v391_v63  ;;  %v396_v61 = vsel %vm392_vm3, %v391_v63, %v1267_v39 }
 0x156   : > { %v439_v15 = vsel %vm437_vm4, %v432_v9, %v436_v25  ;;  %v441_v39 = vsel %vm437_vm4, %v436_v25, %v432_v9  ;;  %v406_v63 = vmul.f32 %v400_v50, %v396_v61  ;;  %v407_v4 = vmul.f32 %v401_v47, %v394_v58 }
 0x157   : > { %v547_v19 = vpop.permute.xlu2 %546  ;;  %v680_v49 = vpop.permute.xlu0 %679  ;;  %v451_v43 = vmul.f32 %v445_v2, %v441_v39  ;;  %v452_v47 = vmul.f32 %v446_v6, %v439_v15 }
 0x158   : > { %v684_v28 = vsel %vm683_vm9, %v1246_v8, %v680_v49  ;;  %v686_v33 = vsel %vm683_vm9, %v680_v49, %v1246_v8  ;;  %v588_v48 = vpop.permute.xlu1 %587  ;;  %v350_v8 = vsel %vm348_vm2, %v1248_v10, %v1269_v42  ;;  %v486_v10 = vsel %vm482_vm5, %v481_v0, %v477_v46 }
 0x159   : > { %v695_v52 = vmul.f32 %v691_v30, %v684_v28  ;;  %v696_v55 = vmul.f32 %v692_v40, %v686_v33  ;;  %v484_v33 = vsel %vm482_vm5, %v477_v46, %v481_v0  ;;  %v361_v42 = vmul.f32 %v355_v56, %v352_v51 }
 0x15a   : > { %v362_v9 = vmul.f32 %v356_v44, %v350_v8  ;;  %v423_v50 = vmul.f32 %v1113_v45, %v406_v63  ;;  %v424_v25 = vmul.f32 %v1113_v45, %v407_v4  ;;  %v497_v46 = vmul.f32 %v491_v35, %v484_v33 }
 0x15b   : > { %v378_v41 = vmul.f32 %v1107_v26, %v361_v42  ;;  %v468_v2 = vmul.f32 %v1161_v20, %v451_v43  ;;  %v469_v59 = vmul.f32 %v1161_v20, %v452_v47  ;;  %v550_v6 = vsel %vm548_vm6, %v543_v14, %v547_v19 }
 0x15c   : > { %v379_v44 = vmul.f32 %v1107_v26, %v362_v9  ;;  %v552_v45 = vsel %vm548_vm6, %v547_v19, %v543_v14  ;;  %v514_v35 = vmul.f32 %v1111_v38, %v497_v46  ;;  %v562_v58 = vmul.f32 %v556_v53, %v550_v6 }
 0x15d   : > { %v563_v14 = vmul.f32 %v557_v62, %v552_v45  ;;  %v535_v53 = vmul.f32 %v1124_v11, %v1134_v17 }
 0x15e   : > { %v579_v54 = vmul.f32 %v1166_v21, %v562_v58 }
 0x15f   : > { %v592_v1 = vpop.permute.xlu2 %591  ;;  %v705_v7 = vpop.permute.xlu0 %704  ;;  %v580_v62 = vmul.f32 %v1166_v21, %v563_v14 }
 0x160   : > { %v712_v12 = vmul.f32 %v705_v7, %v695_v52  ;;  %v713_v31 = vmul.f32 %v705_v7, %v696_v55  ;;  %v633_v56 = vpop.permute.xlu1 %632  ;;  %v595_v52 = vsel %vm593_vm7, %v588_v48, %v592_v1  ;;  %v597_v26 = vsel %vm593_vm7, %v592_v1, %v588_v48 }
 0x161   : > { %v608_v48 = vmul.f32 %v602_v22, %v597_v26 }
 0x162   : > { %v1383_v49 = vadd.f32 %v712_v12, %v671_v16  ;;  %v1385_v28 = vadd.f32 %v713_v31, %v672_v18  ;;  %v496_v16 = vmul.f32 %v490_v27, %v486_v10  ;;  %v427_v27 = vadd.f32 %v423_v50, %v378_v41 }
 0x163   : > { %v428_v18 = vadd.f32 %v424_v25, %v379_v44  ;;  %v607_v12 = vmul.f32 %v601_v32, %v595_v52  ;;  %v625_v22 = vmul.f32 %v1173_v24, %v608_v48 }
 0x164   : > { %v513_v60 = vmul.f32 %v1111_v38, %v496_v16  ;;  %v472_v55 = vadd.f32 %v468_v2, %v427_v27 }
 0x165   : > { %v473_v20 = vadd.f32 %v469_v59, %v428_v18  ;;  %v624_v5 = vmul.f32 %v1173_v24, %v607_v12 }
 0x166   : > { %v517_v61 = vadd.f32 %v513_v60, %v472_v55 }
 0x167   : > { %v637_v0 = vpop.permute.xlu2 %636  ;;  %v518_v7 = vadd.f32 %v514_v35, %v473_v20 }
 0x168   : > { %v640_v19 = vsel %vm638_vm8, %v633_v56, %v637_v0  ;;  %v642_v38 = vsel %vm638_vm8, %v637_v0, %v633_v56  ;;  %v678_v51 = vpop.permute.xlu1 %677  ;;  %v538_v32 = vadd.f32 %v1129_v13, %v517_v61 }
 0x169   : > { %v652_v31 = vmul.f32 %v646_v37, %v640_v19  ;;  %v653_v8 = vmul.f32 %v647_v57, %v642_v38  ;;  %v539_v15 = vadd.f32 %v535_v53, %v518_v7 }
 0x16a   : > { %v583_v21 = vadd.f32 %v579_v54, %v538_v32  ;;  %v773_v32 = vld [vmem:[%s1469_s2] sm:$0xf] }
 0x16b   : > { %v584_v39 = vadd.f32 %v580_v62, %v539_v15  ;;  %v669_v37 = vmul.f32 %v1181_v29, %v652_v31  ;;  %v670_v23 = vmul.f32 %v1181_v29, %v653_v8  ;;  %v995_v15 = vmov 839922192  }
 0x16c   : > { %v628_v57 = vadd.f32 %v624_v5, %v583_v21  ;;  %v831_v5 = vunpack.c.l.s4 %v995_v15  ;;  %v829_v21 = vpop.permute.xlu0 %828 }
 0x16d   : > { %v629_v63 = vadd.f32 %v625_v22, %v584_v39 }
 0x16e   : > { %v673_v33 = vadd.f32 %v669_v37, %v628_v57  ;;  %v832_v22 = vunpack.c.0.s8 %v831_v5 }
 0x16f   : > { %v682_v1 = vpop.permute.xlu2 %681  ;;  %v674_v10 = vadd.f32 %v670_v23, %v629_v63 }
 0x170   : > { %v685_v11 = vsel %vm683_vm9, %v678_v51, %v682_v1  ;;  %v687_v17 = vsel %vm683_vm9, %v682_v1, %v678_v51  ;;  %v731_v47 = vpop.permute.xlu1 %730  ;;  %v833_v23 = vperm.slane %v829_v21, %v832_v22 }
 0x171   : > { %v697_v13 = vmul.f32 %v691_v30, %v685_v11  ;;  %v698_v24 = vmul.f32 %v692_v40, %v687_v17 }
 0x177   : > { %v710_v4 = vpop.permute.xlu2 %709 }
 0x178   : > { %v714_v42 = vmul.f32 %v710_v4, %v697_v13  ;;  %v715_v36 = vmul.f32 %v710_v4, %v698_v24 }
 0x17a   : > { %v718_v9 = vadd.f32 %v714_v42, %v673_v33  ;;  %v719_v43 = vadd.f32 %v715_v36, %v674_v10 }
 0x17c   : > { %v735_v50 = vadd.f32 %v731_v47, %v718_v9  ;;  %v736_v25 = vadd.f32 %v731_v47, %v719_v43 }
 0x17e   : > { %v743_v16 = vmul.f32 0.044715, %v735_v50  ;;  %v744_v29 = vmul.f32 0.044715, %v736_v25  ;;  %v739_v14 = vmul.f32 0.5, %v735_v50  ;;  %v740_v38 = vmul.f32 0.5, %v736_v25 }
 0x17f   : > { %v726_v46 = vpop.permute.xlu2 %725 }
 0x180   : > { %v733_v56 = vadd.f32 %v726_v46, %v1383_v49  ;;  %v734_v30 = vadd.f32 %v726_v46, %v1385_v28  ;;  %v747_v0 = vmul.f32 %v743_v16, %v735_v50  ;;  %v748_v34 = vmul.f32 %v744_v29, %v736_v25 }
 0x182   : > { %v751_v40 = vmul.f32 %v747_v0, %v735_v50  ;;  %v752_v41 = vmul.f32 %v748_v34, %v736_v25  ;;  %v741_v44 = vmul.f32 0.044715, %v733_v56  ;;  %v742_v2 = vmul.f32 0.044715, %v734_v30 }
 0x183   : > { %v737_v1 = vmul.f32 0.5, %v733_v56  ;;  %v738_v62 = vmul.f32 0.5, %v734_v30 }
 0x184   : > { %v755_v59 = vadd.f32 %v751_v40, %v735_v50  ;;  %v756_v6 = vadd.f32 %v752_v41, %v736_v25  ;;  %v745_v45 = vmul.f32 %v741_v44, %v733_v56  ;;  %v746_v27 = vmul.f32 %v742_v2, %v734_v30 }
 0x186   : > { %v759_v18 = vmul.f32 0.7978846, %v755_v59  ;;  %v760_v60 = vmul.f32 0.7978846, %v756_v6  ;;  %v749_v35 = vmul.f32 %v745_v45, %v733_v56  ;;  %v750_v52 = vmul.f32 %v746_v27, %v734_v30 }
 0x188   : > { %970 = vtanh.f32 %v759_v18  ;;  %v753_v26 = vadd.f32 %v749_v35, %v733_v56  ;;  %v754_v49 = vadd.f32 %v750_v52, %v734_v30 }
 0x189   : > { %972 = vtanh.f32 %v760_v60 }
 0x18a   : > { %v757_v55 = vmul.f32 0.7978846, %v753_v26  ;;  %v758_v28 = vmul.f32 0.7978846, %v754_v49 }
 0x18c   : > { %974 = vtanh.f32 %v757_v55 }
 0x18d   : > { %976 = vtanh.f32 %v758_v28 }
 0x18e   : > { %v971_v20 = vpop.eup %970 }
 0x18f   : > { %v973_v58 = vpop.eup %972  ;;  %v767_v19 = vadd.f32 1.0, %v971_v20 }
 0x190   : > { %v768_v61 = vadd.f32 1.0, %v973_v58 }
 0x191   : > { %v771_v7 = vmul.f32 %v767_v19, %v739_v14 }
 0x192   : > { %v975_v12 = vpop.eup %974  ;;  %v772_v48 = vmul.f32 %v768_v61, %v740_v38 }
 0x193   : > { %v977_v53 = vpop.eup %976  ;;  %792 = vmatpush.msra.mxu2 %v771_v7  ;;  %v765_v54 = vadd.f32 1.0, %v975_v12 }
 0x194   : > { %812 = vmatpush.msra.mxu3 %v772_v48  ;;  %v766_v31 = vadd.f32 1.0, %v977_v53 }
 0x195   : > { %v769_v8 = vmul.f32 %v765_v54, %v737_v1 }
 0x196   : > { %v770_v51 = vmul.f32 %v766_v31, %v738_v62 }
 0x197   : > { %793 = vmatpush.msra.mxu2 %v769_v8 }
 0x198   : > { %813 = vmatpush.msra.mxu3 %v770_v51  ;;  %934 = vmatmul.msk.f32.vlgmr.msra.gmra.mxu2 %vm774_vm10, %v773_v32 }
 0x199   : > { %935 = vmatmul.msk.f32.vlgmr.msra.gmra.mxu3 %vm774_vm10, %v773_v32 }
 0x21b   : > { %v795_v17 = vpop.f32.mrf.mxu2 }
 0x21c   : > { %v815_v11 = vpop.f32.mrf.mxu3 }
 0x21d   : > { %v822_v39 = vrot.slane %v815_v11, 4 }
 0x21f   : > { %v823_v37 = vsel %vm251_vm0, %v795_v17, %v822_v39 }
 0x220   : > { %v825_v57 = vadd.f32 %v823_v37, %v1048_v3 }
 0x222   : > { %v835_v63 = vadd.f32 %v833_v23, %v825_v57 }
 0x224   : > { %836 = vst [vmem:[%s224_s11] sm:$0xff] %v835_v63 }
 0x225 PF: > { %s15_s18 = sadd.s32 1, %s984_s18  }
 0x226   : > { %p12_p4 = scmp.ge.s32.totalorder %s15_s18, 4  }
 0x228   :  { %14 = sbr.rel (!%p12_p4) target bundleno = 1 (0x1), region = 88 }

</bundles_post_ra>
